<compile_context>
chip_gen: v5e
topology: v5e:2x2
jax: 0.10.0
libtpu: 0.0.40
codegen_flags: <defaults>
</compile_context>

<pallas_src>
import math

import jax
import jax.numpy as jnp
from jax.experimental import pallas as pl
from jax.experimental.pallas import tpu as pltpu

LANES = 128          # TPU lane width; feature dims are padded to this
BLOCK_B = 128        # batch-tile rows per grid step


# ---------------------------------------------------------------------------
# Pallas kernel: fused  y = x @ W + b  on one (TB, 128) x (128, 128) tile
# ---------------------------------------------------------------------------
def _linear_kernel(x_ref, w_ref, b_ref, o_ref):
    # Blocks are resident in VMEM; matmul runs on the MXU with f32 accumulate.
    acc = jnp.dot(x_ref[...], w_ref[...], preferred_element_type=jnp.float32)
    acc = acc + b_ref[...]               # (1, 128) broadcasts over (TB, 128)
    o_ref[...] = acc.astype(o_ref.dtype)  # full 128-lane (unmasked) store


def linear_pallas(x_pad, w_pad, b_pad, *, block_b=BLOCK_B):
    """y_pad = x_pad @ w_pad + b_pad on lane-padded operands.

    x_pad : [Bp, Kp]   (Bp % block_b == 0, Kp % 128 == 0)
    w_pad : [Kp, Np]   (already transposed + zero-padded, Np % 128 == 0)
    b_pad : [1,  Np]
    """
    Bp, Kp = x_pad.shape
    Np = w_pad.shape[1]
    grid = (Bp // block_b,)

    return pl.pallas_call(
        _linear_kernel,
        out_shape=jax.ShapeDtypeStruct((Bp, Np), x_pad.dtype),
        grid=grid,
        in_specs=[
            pl.BlockSpec((block_b, Kp), lambda i: (i, 0)),   # x: tile batch
            pl.BlockSpec((Kp, Np), lambda i: (0, 0)),        # W: constant block
            pl.BlockSpec((1, Np), lambda i: (0, 0)),         # bias: constant
        ],
        out_specs=pl.BlockSpec((block_b, Np), lambda i: (i, 0)),
        compiler_params=pltpu.CompilerParams(
            dimension_semantics=("parallel",),               # v7x 2-TC sharding
        ),
    )(x_pad, w_pad, b_pad)


def _round_up(n, m):
    return ((n + m - 1) // m) * m


# ---------------------------------------------------------------------------
# The wrapped module (synthetic nn.Linear) and DistModule wrapper
# ---------------------------------------------------------------------------
class InnerLinear:
    """Synthetic stand-in for the torch module wrapped by DistModule."""

    def __init__(self, in_features, out_features, key):
        k_w, k_b = jax.random.split(key)
        bound = 1.0 / math.sqrt(in_features)
        # Deterministic init mirroring nn.Linear's uniform(-1/sqrt(fan_in), ...)
        self.weight = jax.random.uniform(
            k_w, (out_features, in_features), jnp.float32, -bound, bound)
        self.bias = jax.random.uniform(
            k_b, (out_features,), jnp.float32, -bound, bound)
        self.in_features = in_features
        self.out_features = out_features
        self.training = True

        # --- hoisted, lane-padded kernel operands (computed once) ----------
        self._kp = _round_up(in_features, LANES)   # padded K (lane-aligned)
        self._np = _round_up(out_features, LANES)  # padded N (lane-aligned)
        w_t = self.weight.T                        # [D_in, D_out]
        self._w_padded = jnp.zeros((self._kp, self._np), jnp.float32)
        self._w_padded = self._w_padded.at[:in_features, :out_features].set(w_t)
        self._b_padded = jnp.zeros((1, self._np), jnp.float32)
        self._b_padded = self._b_padded.at[0, :out_features].set(self.bias)

    def state_dict(self):
        return {"weight": self.weight, "bias": self.bias}

    def train(self, mode=True):
        self.training = mode

    def __call__(self, x):
        B, _ = x.shape
        # Pad batch to a block multiple and features to the lane width; the
        # zero-padded K columns contribute nothing to the dot product.
        bp = _round_up(max(B, BLOCK_B), BLOCK_B)
        x_pad = jnp.zeros((bp, self._kp), x.dtype)
        x_pad = x_pad.at[:B, :self.in_features].set(x)

        y_pad = linear_pallas(x_pad, self._w_padded, self._b_padded,
                              block_b=BLOCK_B)
        return y_pad[:B, :self.out_features]


def broadcast_params(model):
    # TODO(synk): dist.broadcast is a host-side NCCL/Gloo collective across
    # process ranks; there is no in-kernel Pallas equivalent on a single
    # device.  Parameters are initialized deterministically, so every "rank"
    # already holds identical values -> the broadcast is a semantic no-op.
    for _p in model.state_dict().values():
        pass


class DistModule:
    """JAX mirror of the PyTorch DistModule wrapper."""

    def __init__(self, module):
        self.module = module
        broadcast_params(self.module)

    def __call__(self, *inputs, **kwargs):
        return self.module(*inputs, **kwargs)

    # forward() alias to match torch naming
    def forward(self, *inputs, **kwargs):
        return self.module(*inputs, **kwargs)

    def train(self, mode=True):
        self.training = mode
        self.module.train(mode)


# ---------------------------------------------------------------------------
# Main
# ---------------------------------------------------------------------------
if __name__ == "__main__":
    key = jax.random.PRNGKey(0)
    k_param, k_x = jax.random.split(key)

    # Small shapes; B = 256 exercises the batch grid (2 steps of 128 rows).
    B, D_IN, D_OUT = 256, 32, 32

    inner = InnerLinear(D_IN, D_OUT, k_param)
    model = DistModule(inner)
    model.train(True)

    x = jax.random.normal(k_x, (B, D_IN), dtype=jnp.float32)

    y = model(x)
    y = jax.block_until_ready(y)

    # Reference check (plain JAX) against the Pallas kernel.
    y_ref = x @ inner.weight.T + inner.bias
    assert y.shape == (B, D_OUT)
    assert jnp.allclose(y, y_ref, atol=1e-5, rtol=1e-5)

    print("KERNEL_OK")
</pallas_src>

<mosaic_0001>
module attributes {stable_mosaic.version = 11 : i64} {
  func.func @_linear_kernel(%arg0: i32, %arg1: memref<128x128xf32, #tpu.memory_space<vmem>>, %arg2: memref<128x128xf32, #tpu.memory_space<vmem>>, %arg3: memref<1x128xf32, #tpu.memory_space<vmem>>, %arg4: memref<128x128xf32, #tpu.memory_space<vmem>>) attributes {dimension_semantics = [#tpu.dimension_semantics<parallel>], iteration_bounds = array<i64: 2>, scalar_prefetch = 0 : i64, scratch_operands = 0 : i64, tpu.core_type = #tpu.core_type<tc>, window_params = [{transform_indices = @transform_0, window_bounds = array<i64: 128, 128>}, {pipeline_mode = #tpu.pipeline_mode<synchronous>, transform_indices = @transform_1, window_bounds = array<i64: 128, 128>}, {pipeline_mode = #tpu.pipeline_mode<synchronous>, transform_indices = @transform_2, window_bounds = array<i64: 1, 128>}, {transform_indices = @transform_3, window_bounds = array<i64: 128, 128>}]} {
    %c0 = arith.constant 0 : index
    %c0_0 = arith.constant 0 : index
    %0 = vector.load %arg1[%c0, %c0_0] : memref<128x128xf32, #tpu.memory_space<vmem>>, vector<128x128xf32>
    %c0_1 = arith.constant 0 : index
    %c0_2 = arith.constant 0 : index
    %1 = vector.load %arg2[%c0_1, %c0_2] : memref<128x128xf32, #tpu.memory_space<vmem>>, vector<128x128xf32>
    %cst = arith.constant dense<0.000000e+00> : vector<128x128xf32>
    %2 = tpu.matmul %0, %1, %cst {dimension_numbers = #tpu.dot_dimension_numbers<[1], [0], [0], [1], [0, 0, 1, 1], [], []>} : vector<128x128xf32>, vector<128x128xf32>, vector<128x128xf32> -> vector<128x128xf32>
    %c0_3 = arith.constant 0 : index
    %c0_4 = arith.constant 0 : index
    %3 = vector.load %arg3[%c0_3, %c0_4] : memref<1x128xf32, #tpu.memory_space<vmem>>, vector<1x128xf32>
    %4 = vector.broadcast %3 : vector<1x128xf32> to vector<128x128xf32>
    %5 = arith.addf %2, %4 : vector<128x128xf32>
    %c0_5 = arith.constant 0 : index
    %c0_6 = arith.constant 0 : index
    %6 = vector.load %arg4[%c0_5, %c0_6] : memref<128x128xf32, #tpu.memory_space<vmem>>, vector<128x128xf32>
    tpu.vector_store %arg4[%c0_5, %c0_6], %5 {strides = array<i32>} : memref<128x128xf32, #tpu.memory_space<vmem>>, vector<128x128xf32>,
    return
  }
  func.func @transform_0(%arg0: i32) -> (i32, i32) {
    %c0_i32 = arith.constant 0 : i32
    %c0_i32_0 = arith.constant 0 : i32
    return %arg0, %c0_i32 : i32, i32
  }
  func.func @transform_1(%arg0: i32) -> (i32, i32) {
    %c0_i32 = arith.constant 0 : i32
    %c0_i32_0 = arith.constant 0 : i32
    %c0_i32_1 = arith.constant 0 : i32
    return %c0_i32, %c0_i32_0 : i32, i32
  }
  func.func @transform_2(%arg0: i32) -> (i32, i32) {
    %c0_i32 = arith.constant 0 : i32
    %c0_i32_0 = arith.constant 0 : i32
    %c0_i32_1 = arith.constant 0 : i32
    return %c0_i32, %c0_i32_0 : i32, i32
  }
  func.func @transform_3(%arg0: i32) -> (i32, i32) {
    %c0_i32 = arith.constant 0 : i32
    %c0_i32_0 = arith.constant 0 : i32
    return %arg0, %c0_i32 : i32, i32
  }
}

</mosaic_0001>

<bundles_post_ra>
// kernel: tpu_custom_call.1
= control target key start
LH: loop header
LB: loop body
LE: loop exit
PB: predicated region body
PF: predicated region fallthrough
CT: control target
= control target key end

     0   :  { %8 = vsyncpa [#allocation3], 0  ;;  %s899_s0 = inlined_call_operand.hbm [shape: f32[256,128], index: 0, kind: input, shape index: {}]   ;;  %s900_s1 = inlined_call_operand.hbm [shape: f32[128,128], index: 1, kind: input, shape index: {}]   ;;  %s901_s2 = inlined_call_operand.vmem [shape: f32[1,128], index: 2, kind: input, shape index: {}]   ;;  %s902_s3 = inlined_call_operand.hbm [shape: f32[256,128], index: 3, kind: output, shape index: {}]  }
   0x1   :  { %10 = vsyncpa [#allocation3 + $0x1], 0 }
   0x2   :  { %11 = vsyncpa [#allocation6], 0 }
   0x3   :  { %12 = vsyncpa [#allocation4], 0 }
   0x4   :  { %14 = vsyncpa [#allocation4 + $0x1], 0  ;;  %s711_s12 = smov 0   ;;  %s713_s13 = smov 0  }
   0x5   :  { %s715_s14 = smov 0   ;;  %s717_s15 = smov 0  }
   0x6 LB: > { %s732_s16 = sadd.s32 4294967295, %s684_s15   ;;  %s426_s17 = sadd.s32 4294967294, %s684_s15   ;;  %s684_s15 = sphi %s717_s15, %s912_s15   ;;  %s680_s14 = sphi %s715_s14, %s911_s14   ;;  %s676_s13 = sphi %s713_s13, %s910_s13   ;;  %s672_s12 = sphi %s711_s12, %s909_s12  }
   0x7   : > { %p40_p0 = scmp.ne.s32.totalorder %s676_s13, %s672_s12  ;;  %p41_p1 = scmp.eq.s32.totalorder %s732_s16, 0 }
   0x8   : > { %p106_p2 = scmp.eq.s32.totalorder %s732_s16, 1  ;;  %p112_p3 = scmp.eq.s32.totalorder %s426_s17, 1 }
   0x9   : > { %p741_p4 = por %p41_p1, %p40_p0  ;;  %p427_p5 = scmp.ge.s32.totalorder %s684_s15, 1 }
   0xa   : > { %p746_p6 = por %p112_p3, %p40_p0  ;;  %p119_p7 = scmp.lt.s32.totalorder %s684_s15, 3 }
   0xb   : > { %s130_s22 = sshll.u32 %s900_s1, 4  ;;  %s686_s24 = smov [#allocation5]   ;;  %s131_s22 = int_to_ptr.hbm [resolvable:$true] %s130_s22 }
   0xc   : > { %p754_p8 = pnand %p427_p5, %p119_p7  ;;  %s132_s25 = sshll.u32 %s686_s24, 4  ;;  %s133_s25 = int_to_ptr.vmem [resolvable:$true] %s132_s25 }
   0xd   : > { %s764_s26 = sadd.s32 1, %s684_s15   ;;  %s687_s27 = smov 128  }
   0xe   : > { %p500_p9 = pneg %p754_p8  ;;  %s688_s28 = smov 8  }
   0xf   : > { %s24_s29 = ssub.s32 %s684_s15, %s764_s26  ;;  %s27_s30 = sadd.s32 1, %s680_s14 }
  0x10   : > { %p501_p10 = pnand %p500_p9, %p41_p1  ;;  %p25_p12 = scmp.eq.s32.totalorder %s24_s29, 0 }
  0x11   : > { %p34_p13 = scmp.ne.s32.totalorder %s680_s14, %s676_s13  ;;  %p35_p0 = scmp.eq.s32.totalorder %s684_s15, 0 }
  0x12   : > { %503 = dma.hbm_to_vmem [thread:$0]  (!%p501_p10), %s131_s22, 2048, %s133_s25, [#allocation6], %s687_s27, %s687_s27, %s688_s28  }
  0x13   : > { %s776_s4 = scalar_select %p25_p12, %s680_s14, %s27_s30  }
  0x14   : > { %p780_p3 = por %p106_p2, %p34_p13  ;;  %p513_p5 = scmp.lt.s32.totalorder %s684_s15, 2 }
  0x15   : > { %s149_s6 = sand.u32 1, %s680_s14   ;;  %s442_s7 = sshll.u32 %s684_s15, 7 }
  0x16   : > { %p36_p7 = por %p35_p0, %p34_p13  ;;  %s430_s8 = sshll.u32 %s149_s6, 7 }
  0x17   : > { %s158_s11 = scalar_lea.hbm %s899_s0, %s442_s7  ;;  %s153_s20 = scalar_lea.vmem [#allocation2], %s430_s8 }
  0x18   : > { %s159_s17 = sshll.u32 %s158_s11, 4  ;;  %s161_s21 = sshll.u32 %s153_s20, 4  ;;  %s160_s17 = int_to_ptr.hbm [resolvable:$true] %s159_s17  ;;  %s162_s21 = int_to_ptr.vmem [resolvable:$true] %s161_s21 }
  0x19   : > { %p790_p9 = pnand %p513_p5, %p36_p7  ;;  %s150_s24 = scalar_lea.sflag [#allocation3], %s149_s6 }
  0x1a   : > { %s584_s25 = sshra.s32 %s160_s17, 4  ;;  %s591_s8 = scalar_lea.hbm %s899_s0, 256  ;;  %s585_s25 = int_to_ptr.hbm [resolvable:$true] %s584_s25 }
  0x1b   : > { %s586_s29 = scalar_lea.hbm %s585_s25, 128  ;;  %p588_p10 = pneg %p790_p9 }
  0x1c   : > { %p587_p2 = scmp.ne.s32.totalorder %s585_s25, %s586_s29  ;;  %p592_p0 = scmp.lt.s32.totalorder %s585_s25, %s899_s0 }
  0x1d   : > { %p593_p5 = scmp.lt.s32.totalorder %s591_s8, %s586_s29 }
  0x1e   : > { %p589_p12 = pnand %p588_p10, %p587_p2 }
  0x1f   : > { %p594_p7 = por %p593_p5, %p592_p0 }
  0x20   : > { %p590_p13 = pneg %p589_p12 }
  0x22   : > { %p595_p11 = pnand %p594_p7, %p590_p13 }
  0x24   : > { %598 = shalt.err (!%p595_p11)
}
  0x25   : > { %507 = dma.hbm_to_vmem [thread:$0]  (!%p790_p9), %s160_s17, 2048, %s162_s21, %s150_s24, %s687_s27, %s687_s27, %s688_s28  }
  0x26   : > { %173 = sbr.rel (%p754_p8) target bundleno = 241 (0xf1), region = 32  ;;  %s810_s6 = sand.u32 (!%p754_p8), 1, %s676_s13  }
  0x27   : > { %s434_s11 = sshll.u32 (!%p754_p8), %s810_s6, 7  ;;  %s176_s20 = scalar_lea.sflag (!%p754_p8), [#allocation3], %s810_s6 }
  0x28   : > { %s816_s25 = scalar_lea.vmem (!%p754_p8), [#allocation2], %s434_s11 }
  0x2b   : > { %659 = dma.done.wait (%p741_p4), %s176_s20, 2048  }
  0x2c   : > { %661 = vsyncadd (%p741_p4), %s176_s20, 4294965248 }
  0x2d   : > { %663 = dma.done.wait (%p41_p1), [#allocation6], 2048  }
  0x2e   : > { %665 = vsyncadd (%p41_p1), [#allocation6], 4294965248  ;;  %v241_v0 = vld [vmem:[#allocation5 + $0x78] sm:$0xff]  ;;  %v240_v1 = vld [vmem:[#allocation5 + $0x70] sm:$0xff]  ;;  %s847_s27 = scalar_lea.vmem [#allocation7], %s434_s11  ;;  %s443_s28 = sshll.u32 %s732_s16, 7 }
  0x2f   : > { %445 = vmatpush.msra.mxu2 %v241_v0  ;;  %446 = vmatpush.msra.mxu3 %v241_v0  ;;  %v239_v2 = vld [vmem:[#allocation5 + $0x68] sm:$0xff]  ;;  %v238_v3 = vld [vmem:[#allocation5 + $0x60] sm:$0xff]  ;;  %v237_v4 = vld [vmem:[#allocation5 + $0x58] sm:$0xff]  ;;  %s339_s22 = scalar_lea.hbm %s902_s3, %s443_s28  ;;  %s340_s24 = sshll.u32 %s847_s27, 4  ;;  %s341_s24 = int_to_ptr.vmem [resolvable:$true] %s340_s24 }
  0x30   : > { %246 = vmatpush.msra.mxu0 %v241_v0  ;;  %444 = vmatpush.msra.mxu1 %v241_v0  ;;  %v236_v5 = vld [vmem:[#allocation5 + $0x50] sm:$0xff]  ;;  %v235_v6 = vld [vmem:[#allocation5 + $0x48] sm:$0xff]  ;;  %v234_v7 = vld [vmem:[#allocation5 + $0x40] sm:$0xff]  ;;  %s342_s29 = sshll.u32 %s339_s22, 4  ;;  %s328_s16 = scalar_lea.sflag [#allocation4], %s810_s6  ;;  %s343_s29 = int_to_ptr.hbm [resolvable:$true] %s342_s29 }
  0x31   : > { %448 = vmatpush.msra.mxu2 %v240_v1  ;;  %449 = vmatpush.msra.mxu3 %v240_v1  ;;  %v233_v8 = vld [vmem:[#allocation5 + $0x38] sm:$0xff]  ;;  %v232_v9 = vld [vmem:[#allocation5 + $0x30] sm:$0xff]  ;;  %v231_v10 = vld [vmem:[#allocation5 + $0x28] sm:$0xff]  ;;  %s628_s30 = sshra.s32 %s343_s29, 4  ;;  %s634_s10 = scalar_lea.hbm %s902_s3, 256  ;;  %s629_s30 = int_to_ptr.hbm [resolvable:$true] %s628_s30 }
  0x32   : > { %247 = vmatpush.msra.mxu0 %v240_v1  ;;  %447 = vmatpush.msra.mxu1 %v240_v1  ;;  %v230_v11 = vld [vmem:[#allocation5 + $0x20] sm:$0xff]  ;;  %v229_v12 = vld [vmem:[#allocation5 + $0x18] sm:$0xff]  ;;  %v228_v13 = vld [vmem:[#allocation5 + $0x10] sm:$0xff]  ;;  %s630_s7 = scalar_lea.hbm %s629_s30, 128  ;;  %p635_p11 = scmp.lt.s32.totalorder %s629_s30, %s902_s3 }
  0x33   : > { %451 = vmatpush.msra.mxu2 %v239_v2  ;;  %452 = vmatpush.msra.mxu3 %v239_v2  ;;  %v227_v14 = vld [vmem:[#allocation5 + $0x8] sm:$0xff]  ;;  %v226_v15 = vld [vmem:[#allocation5] sm:$0xff]  ;;  %v220_v24 = vld [vmem:[%s816_s25 + $0x50] sm:$0xff]  ;;  %p631_p1 = scmp.ne.s32.totalorder %s629_s30, %s630_s7  ;;  %p636_p9 = scmp.lt.s32.totalorder %s634_s10, %s630_s7 }
  0x34   : > { %248 = vmatpush.msra.mxu0 %v239_v2  ;;  %450 = vmatpush.msra.mxu1 %v239_v2  ;;  %v218_v16 = vld [vmem:[%s816_s25 + $0x40] sm:$0xff]  ;;  %v219_v20 = vld [vmem:[%s816_s25 + $0x48] sm:$0xff]  ;;  %v224_v25 = vld [vmem:[%s816_s25 + $0x70] sm:$0xff] }
  0x35   : > { %454 = vmatpush.msra.mxu2 %v238_v3  ;;  %455 = vmatpush.msra.mxu3 %v238_v3  ;;  %v222_v17 = vld [vmem:[%s816_s25 + $0x60] sm:$0xff]  ;;  %v223_v21 = vld [vmem:[%s816_s25 + $0x68] sm:$0xff]  ;;  %v212_v26 = vld [vmem:[%s816_s25 + $0x10] sm:$0xff]  ;;  %p632_p4 = pnand %p631_p1, %p780_p3  ;;  %p637_p2 = por %p636_p9, %p635_p11 }
  0x36   : > { %249 = vmatpush.msra.mxu0 %v238_v3  ;;  %453 = vmatpush.msra.mxu1 %v238_v3  ;;  %v210_v18 = vld [vmem:[%s816_s25] sm:$0xff]  ;;  %v211_v22 = vld [vmem:[%s816_s25 + $0x8] sm:$0xff]  ;;  %v216_v27 = vld [vmem:[%s816_s25 + $0x30] sm:$0xff] }
  0x37   : > { %457 = vmatpush.msra.mxu2 %v237_v4  ;;  %458 = vmatpush.msra.mxu3 %v237_v4  ;;  %v214_v19 = vld [vmem:[%s816_s25 + $0x20] sm:$0xff]  ;;  %v215_v23 = vld [vmem:[%s816_s25 + $0x28] sm:$0xff]  ;;  %v221_v28 = vld [vmem:[%s816_s25 + $0x58] sm:$0xff]  ;;  %p633_p8 = pneg %p632_p4 }
  0x38   : > { %250 = vmatpush.msra.mxu0 %v237_v4  ;;  %456 = vmatpush.msra.mxu1 %v237_v4  ;;  %v225_v29 = vld [vmem:[%s816_s25 + $0x78] sm:$0xff]  ;;  %v553_v32 = vld [vmem:[%s901_s2] ss:$0 sm:$0xff] }
  0x39   : > { %460 = vmatpush.msra.mxu2 %v236_v5  ;;  %461 = vmatpush.msra.mxu3 %v236_v5  ;;  %v213_v30 = vld [vmem:[%s816_s25 + $0x18] sm:$0xff]  ;;  %p638_p10 = pnand %p637_p2, %p633_p8 }
  0x3a   : > { %251 = vmatpush.msra.mxu0 %v236_v5  ;;  %459 = vmatpush.msra.mxu1 %v236_v5  ;;  %v217_v31 = vld [vmem:[%s816_s25 + $0x38] sm:$0xff] }
  0x3b   : > { %463 = vmatpush.msra.mxu2 %v235_v6  ;;  %464 = vmatpush.msra.mxu3 %v235_v6 }
  0x3c   : > { %252 = vmatpush.msra.mxu0 %v235_v6  ;;  %462 = vmatpush.msra.mxu1 %v235_v6 }
  0x3d   : > { %466 = vmatpush.msra.mxu2 %v234_v7  ;;  %467 = vmatpush.msra.mxu3 %v234_v7 }
  0x3e   : > { %253 = vmatpush.msra.mxu0 %v234_v7  ;;  %465 = vmatpush.msra.mxu1 %v234_v7 }
  0x3f   : > { %469 = vmatpush.msra.mxu2 %v233_v8  ;;  %470 = vmatpush.msra.mxu3 %v233_v8 }
  0x40   : > { %254 = vmatpush.msra.mxu0 %v233_v8  ;;  %468 = vmatpush.msra.mxu1 %v233_v8 }
  0x41   : > { %472 = vmatpush.msra.mxu2 %v232_v9  ;;  %473 = vmatpush.msra.mxu3 %v232_v9 }
  0x42   : > { %255 = vmatpush.msra.mxu0 %v232_v9  ;;  %471 = vmatpush.msra.mxu1 %v232_v9 }
  0x43   : > { %475 = vmatpush.msra.mxu2 %v231_v10  ;;  %476 = vmatpush.msra.mxu3 %v231_v10 }
  0x44   : > { %256 = vmatpush.msra.mxu0 %v231_v10  ;;  %474 = vmatpush.msra.mxu1 %v231_v10 }
  0x45   : > { %478 = vmatpush.msra.mxu2 %v230_v11  ;;  %479 = vmatpush.msra.mxu3 %v230_v11 }
  0x46   : > { %257 = vmatpush.msra.mxu0 %v230_v11  ;;  %477 = vmatpush.msra.mxu1 %v230_v11 }
  0x47   : > { %481 = vmatpush.msra.mxu2 %v229_v12  ;;  %482 = vmatpush.msra.mxu3 %v229_v12 }
  0x48   : > { %258 = vmatpush.msra.mxu0 %v229_v12  ;;  %480 = vmatpush.msra.mxu1 %v229_v12 }
  0x49   : > { %484 = vmatpush.msra.mxu2 %v228_v13  ;;  %485 = vmatpush.msra.mxu3 %v228_v13 }
  0x4a   : > { %259 = vmatpush.msra.mxu0 %v228_v13  ;;  %483 = vmatpush.msra.mxu1 %v228_v13 }
  0x4b   : > { %487 = vmatpush.msra.mxu2 %v227_v14  ;;  %488 = vmatpush.msra.mxu3 %v227_v14 }
  0x4c   : > { %260 = vmatpush.msra.mxu0 %v227_v14  ;;  %486 = vmatpush.msra.mxu1 %v227_v14 }
  0x4d   : > { %490 = vmatpush.msra.mxu2 %v226_v15  ;;  %491 = vmatpush.msra.mxu3 %v226_v15 }
  0x4e   : > { %286 = vmatmul.f32.vlgmr.msra.gmra.mxu2 %v218_v16  ;;  %298 = vmatmul.f32.vlgmr.msra.gmra.mxu3 %v222_v17 }
  0x4f   : > { %261 = vmatpush.msra.mxu0 %v226_v15  ;;  %489 = vmatpush.msra.mxu1 %v226_v15 }
  0x50   : > { %262 = vmatmul.f32.vlgmr.msra.gmra.mxu0 %v210_v18  ;;  %274 = vmatmul.f32.vlgmr.msra.gmra.mxu1 %v214_v19 }
  0x56   : > { %289 = vmatmul.f32.gmra.mxu2 %v219_v20  ;;  %301 = vmatmul.f32.gmra.mxu3 %v223_v21 }
  0x58   : > { %265 = vmatmul.f32.gmra.mxu0 %v211_v22  ;;  %277 = vmatmul.f32.gmra.mxu1 %v215_v23 }
  0x5e   : > { %292 = vmatmul.f32.gmra.mxu2 %v220_v24  ;;  %304 = vmatmul.f32.gmra.mxu3 %v224_v25 }
  0x60   : > { %268 = vmatmul.f32.gmra.mxu0 %v212_v26  ;;  %280 = vmatmul.f32.gmra.mxu1 %v216_v27 }
  0x66   : > { %295 = vmatmul.f32.gmra.mxu2 %v221_v28  ;;  %307 = vmatmul.f32.gmra.mxu3 %v225_v29 }
  0x68   : > { %271 = vmatmul.f32.gmra.mxu0 %v213_v30  ;;  %283 = vmatmul.f32.gmra.mxu1 %v217_v31 }
  0xcd   : > { %v263_v33 = vpop.f32.mrf.mxu0  ;;  %v275_v34 = vpop.f32.mrf.mxu1 }
  0xce   : > { %v264_v35 = vadd.f32 %v553_v32, %v263_v33  ;;  %v276_v36 = vadd.f32 %v553_v32, %v275_v34 }
  0xd0   : > { %311 = vst [vmem:[%s847_s27] sm:$0xff] %v264_v35 }
  0xd1   : > { %315 = vst [vmem:[%s847_s27 + $0x20] sm:$0xff] %v276_v36  ;;  %v287_v37 = vpop.f32.mrf.mxu2  ;;  %v299_v38 = vpop.f32.mrf.mxu3 }
  0xd2   : > { %v288_v39 = vadd.f32 %v553_v32, %v287_v37  ;;  %v300_v40 = vadd.f32 %v553_v32, %v299_v38 }
  0xd4   : > { %319 = vst [vmem:[%s847_s27 + $0x40] sm:$0xff] %v288_v39 }
  0xd5   : > { %323 = vst [vmem:[%s847_s27 + $0x60] sm:$0xff] %v300_v40  ;;  %v266_v41 = vpop.f32.mrf.mxu0  ;;  %v278_v42 = vpop.f32.mrf.mxu1 }
  0xd6   : > { %v267_v43 = vadd.f32 %v553_v32, %v266_v41  ;;  %v279_v44 = vadd.f32 %v553_v32, %v278_v42 }
  0xd8   : > { %312 = vst [vmem:[%s847_s27 + $0x8] sm:$0xff] %v267_v43 }
  0xd9   : > { %316 = vst [vmem:[%s847_s27 + $0x28] sm:$0xff] %v279_v44  ;;  %v290_v45 = vpop.f32.mrf.mxu2  ;;  %v302_v46 = vpop.f32.mrf.mxu3 }
  0xda   : > { %v291_v47 = vadd.f32 %v553_v32, %v290_v45  ;;  %v303_v48 = vadd.f32 %v553_v32, %v302_v46 }
  0xdc   : > { %320 = vst [vmem:[%s847_s27 + $0x48] sm:$0xff] %v291_v47 }
  0xdd   : > { %324 = vst [vmem:[%s847_s27 + $0x68] sm:$0xff] %v303_v48  ;;  %v269_v49 = vpop.f32.mrf.mxu0  ;;  %v281_v50 = vpop.f32.mrf.mxu1 }
  0xde   : > { %v270_v51 = vadd.f32 %v553_v32, %v269_v49  ;;  %v282_v52 = vadd.f32 %v553_v32, %v281_v50 }
  0xe0   : > { %313 = vst [vmem:[%s847_s27 + $0x10] sm:$0xff] %v270_v51 }
  0xe1   : > { %317 = vst [vmem:[%s847_s27 + $0x30] sm:$0xff] %v282_v52  ;;  %v293_v53 = vpop.f32.mrf.mxu2  ;;  %v305_v54 = vpop.f32.mrf.mxu3 }
  0xe2   : > { %v294_v55 = vadd.f32 %v553_v32, %v293_v53  ;;  %v306_v56 = vadd.f32 %v553_v32, %v305_v54 }
  0xe4   : > { %321 = vst [vmem:[%s847_s27 + $0x50] sm:$0xff] %v294_v55 }
  0xe5   : > { %325 = vst [vmem:[%s847_s27 + $0x70] sm:$0xff] %v306_v56  ;;  %v272_v57 = vpop.f32.mrf.mxu0  ;;  %v284_v58 = vpop.f32.mrf.mxu1 }
  0xe6   : > { %v273_v59 = vadd.f32 %v553_v32, %v272_v57  ;;  %v285_v60 = vadd.f32 %v553_v32, %v284_v58 }
  0xe8   : > { %314 = vst [vmem:[%s847_s27 + $0x18] sm:$0xff] %v273_v59 }
  0xe9   : > { %318 = vst [vmem:[%s847_s27 + $0x38] sm:$0xff] %v285_v60  ;;  %v296_v61 = vpop.f32.mrf.mxu2  ;;  %v308_v62 = vpop.f32.mrf.mxu3 }
  0xea   : > { %v297_v63 = vadd.f32 %v553_v32, %v296_v61  ;;  %v309_v0 = vadd.f32 %v553_v32, %v308_v62 }
  0xec   : > { %322 = vst [vmem:[%s847_s27 + $0x58] sm:$0xff] %v297_v63 }
  0xed   : > { %326 = vst [vmem:[%s847_s27 + $0x78] sm:$0xff] %v309_v0 }
  0xee   : > { %641 = shalt.err (!%p638_p10)
}
  0xef   : > { %s689_s6 = smov 128   ;;  %s690_s25 = smov 8  }
  0xf0   : > { %498 = dma.vmem_to_hbm [thread:$0]  (%p780_p3), %s341_s24, 2048, %s343_s29, %s328_s16, %s689_s6, %s689_s6, %s690_s25  }
  0xf1 PF: > { %s357_s18 = sand.u32 1, %s672_s12   ;;  %p908_p12 = scmp.ge.s32.totalorder %s684_s15, 2 }
  0xf2   : > { %s358_s23 = scalar_lea.sflag [#allocation4], %s357_s18 }
  0xf3   : > { %p509_p13 = pnand %p908_p12, %p746_p6 }
  0xf5   : > { %p510_p0 = pneg %p509_p13 }
  0xf7   : > { %667 = dma.done.wait (%p510_p0), %s358_s23, 2048  }
  0xf8   : > { %669 = vsyncadd (%p510_p0), %s358_s23, 4294965248  ;;  %p17_p5 = scmp.ge.s32.totalorder %s764_s26, 4   ;;  %s909_s12 = smov %s676_s13 }
  0xf9   : > { %s910_s13 = smov %s680_s14  ;;  %s911_s14 = smov %s776_s4 }
  0xfa   : > { %s912_s15 = smov %s764_s26  ;;  %19 = sbr.rel (!%p17_p5) target bundleno = 6 (0x6), region = 81 }
  0xff   :  { %364 = vsyncpa [#allocation3], 1 }
 0x100   :  { %366 = vsyncpa [#allocation3 + $0x1], 1 }
 0x101   :  { %367 = vsyncpa [#allocation6], 1 }
 0x102   :  { %368 = vsyncpa [#allocation4], 1 }
 0x103   :  { %370 = vsyncpa [#allocation4 + $0x1], 1 }

</bundles_post_ra>
